<compile_context>
chip_gen: v7x
topology: tpu7x:2x2x1
jax: 0.10.0
libtpu: 0.0.40
codegen_flags: <defaults>
</compile_context>

<pallas_src>
import math
import functools

import numpy as np
import jax
import jax.numpy as jnp
from jax import lax
from jax.experimental import pallas as pl
from jax.experimental.pallas import tpu as pltpu


LANE = 128  # every plane is padded to this many lanes (spatial = 81 -> 128)


# --------------------------- static shape helpers ----------------------------

def _conv_out(n, k, s, p):
    return (n + 2 * p - k) // s + 1


def _inbounds_range(n_in, s, p, n_out):
    """Output positions i in [0, n_out) whose 1x1-conv sample s*i-p hits [0, n_in)."""
    i0 = max(0, -(-p // s))                      # ceil(p / s)
    i1 = min(n_out, (n_in - 1 + p) // s + 1)
    return i0, i1


def _sample_plane(plane, s, p, oh, ow):
    """out[i, j] = plane[s*i - p, s*j - p] where in-bounds, else 0.  Shape (oh, ow)."""
    ih, iw = plane.shape
    i0, i1 = _inbounds_range(ih, s, p, oh)
    j0, j1 = _inbounds_range(iw, s, p, ow)
    out = jnp.zeros((oh, ow), plane.dtype)
    if i1 > i0 and j1 > j0:
        rs, cs = s * i0 - p, s * j0 - p
        sub = plane[rs: rs + s * (i1 - i0 - 1) + 1: s,
                    cs: cs + s * (j1 - j0 - 1) + 1: s]
        out = out.at[i0:i1, j0:j1].set(sub)
    return out


def _gather_pairs(ih, iw, s, p, oh, ow):
    """Static (flat_src, flat_dst) pairs so that out[i,j] = plane[s*i-p, s*j-p]."""
    i0, i1 = _inbounds_range(ih, s, p, oh)
    j0, j1 = _inbounds_range(iw, s, p, ow)
    return tuple(((s * i - p) * iw + (s * j - p), i * ow + j)
                 for i in range(i0, i1) for j in range(j0, j1))


# ------------------------------ fused kernel ---------------------------------

def _fused_kernel(packed_ref, o_ref, *, lane):
    # packed row layout (all slice offsets are multiples of 8):
    #   [0, lane)            Xd  : data matrix (rows 0-8 im2col taps, 9 c1x,
    #                              10 c2x, 11 ones(bias), rest zero)
    #   [lane, lane+8)       W   : per-output-row weights
    #                              (cols 0..8 taps, 9 c1x-w, 10 c2x-w, 11 bias)
    #   [lane+8, 2*lane+8)   Pw1 : stride-2/pad-10 gather matrix * conv1 weight
    f32 = jnp.float32
    hi = lax.Precision.HIGHEST

    Xd = packed_ref[0:lane, :]
    W = packed_ref[lane:lane + 8, :]
    Pw1 = packed_ref[lane + 8:2 * lane + 8, :]

    # One MXU dot produces every pre-resample plane (biases via the ones row):
    #   D rows: 0=c3 (conv2)   1=c40 (conv3 ch0)  2=c41 (conv3 ch1)
    #           3=v5c0 (conv4 ch0)  4=c1 (conv on x)  5=c2 (conv1 on x)
    #           6=b1 broadcast      7=unused
    D = jnp.dot(W, Xd, preferred_element_type=f32, precision=hi)        # (8, lane)
    b1v = D[6:7, :]

    # v6 crop: conv1 (1x1, stride 2, pad 10) on v5 channel 0 -> matmul resample.
    # Zero rows/cols of Pw1 reproduce the zero-padded region exactly, so +b1
    # matches the reference conv's bias there.
    # TODO(synk): original v6 = conv1(v5) is ill-formed (conv1 expects 1 input
    # channel, v5 has 3); repaired by applying conv1 to channel 0 of v5.
    R = jnp.dot(D, Pw1, preferred_element_type=f32, precision=hi)       # (8, lane)
    c6 = R[3:4, :] + b1v

    # TODO(synk): original v7 = v1+v3+v4+v6 mixes incompatible spatial sizes;
    # repaired by top-left crop to common min spatial + channel broadcast.
    base = D[0:1, :] + D[4:5, :] + c6            # c3 + c1 + c6
    v7 = base + D[1:3, :]                        # (2, lane): [+c40 ; +c41]

    # v8 crop: conv1 on v7 channel 0 (same resample matrix).
    # TODO(synk): conv1 applied to channel 0 of v7 (conv1 expects 1 in-channel).
    R2 = jnp.dot(v7, Pw1, preferred_element_type=f32, precision=hi)     # (2, lane)
    c8 = R2[0:1, :] + b1v

    # v9 = v2 + v7 + v8 (cropped/broadcast) + tanh-GELU tail, both channels at once.
    v9 = (D[5:6, :] + c8) + v7                                          # (2, lane)
    v12 = (v9 * v9) * v9
    v15 = (v9 + v12 * 0.044715) * 0.7978845608028654
    o_ref[...] = (v9 * 0.5) * (jnp.tanh(v15) + 1.0)


# -------------------------------- wrapper -------------------------------------

def model_forward(params, x):
    n, cin, h, w = x.shape
    assert n == 1 and cin == 1

    # Static output geometry (matches the repaired reference semantics).
    o1 = _conv_out(h, 1, 2, 20)            # v1
    o2 = _conv_out(h, 1, 2, 10)            # v2
    o3 = _conv_out(h, 3, 2, 2)             # v3 / v4 / v5
    o6 = _conv_out(o3, 1, 2, 10)           # v6
    s7 = min(o1, o3, o6)                   # spatial of v7 after top-left crop
    o8 = _conv_out(s7, 1, 2, 10)           # v8
    s9 = min(o2, s7, o8)                   # final spatial

    S = s7
    sp = S * S
    L = LANE
    # The fused kernel is specialised for small inputs (true for the 16x16 test):
    assert s9 == S, "final crop must equal v7 crop for the fused kernel"
    assert 2 * (S - 1) - 10 <= S - 1, "v6/v8 samples must stay inside the (S,S) planes"
    assert sp <= L

    x2d = x[0, 0].astype(jnp.float32)

    # -- layout-only glue (runs once; fused into the prologue under jit) -------
    # Shared lane-dense im2col (9, S*S) for the three 3x3/stride-2/pad-2 convs.
    xp2 = jnp.pad(x2d, ((2, 2), (2, 2)))
    taps = [xp2[di: di + 2 * (S - 1) + 1: 2,
                dj: dj + 2 * (S - 1) + 1: 2].reshape(sp)
            for di in range(3) for dj in range(3)]
    # Sampled-x planes for the 1x1 strided/padded convs on x (v1, v2 crops).
    c1x = _sample_plane(x2d, 2, 20, S, S).reshape(sp)
    c2x = _sample_plane(x2d, 2, 10, S, S).reshape(sp)

    Xd = jnp.zeros((L, L), jnp.float32)
    Xd = Xd.at[0:11, 0:sp].set(jnp.stack(taps + [c1x, c2x], axis=0))
    Xd = Xd.at[11, :].set(1.0)                       # ones row -> bias column

    # Weight matrix W (8, L): cols 0..8 = 3x3 taps, 9 = c1x weight,
    # 10 = c2x weight, 11 = bias (paired with the ones row of Xd).
    def s1(v):
        return jnp.asarray(v, jnp.float32).reshape(1)

    z1 = jnp.zeros((1,), jnp.float32)
    z9 = jnp.zeros((9,), jnp.float32)
    w2 = params['conv2_w'].reshape(9).astype(jnp.float32)
    w3 = params['conv3_w'].reshape(2, 9).astype(jnp.float32)
    w40 = params['conv4_w'][0].reshape(9).astype(jnp.float32)  # only ch0 of v5 is consumed
    wpt = s1(params['conv_w'])
    w1 = s1(params['conv1_w'])
    b1 = s1(params['conv1_b'])

    rows = [
        jnp.concatenate([w2,    z1,  z1, s1(params['conv2_b'])]),   # c3
        jnp.concatenate([w3[0], z1,  z1, s1(params['conv3_b'][0])]),# c40
        jnp.concatenate([w3[1], z1,  z1, s1(params['conv3_b'][1])]),# c41
        jnp.concatenate([w40,   z1,  z1, s1(params['conv4_b'][0])]),# v5 ch0
        jnp.concatenate([z9,    wpt, z1, z1]),                      # c1 (no bias)
        jnp.concatenate([z9,    z1,  w1, b1]),                      # c2
        jnp.concatenate([z9,    z1,  z1, b1]),                      # b1 broadcast row
        jnp.zeros((12,), jnp.float32),                              # unused
    ]
    Wm = jnp.pad(jnp.stack(rows, axis=0), ((0, 0), (0, L - 12)))    # (8, L)

    # Static 0/1 gather matrix for the stride-2/pad-10 1x1 conv on an (S,S)
    # plane, pre-scaled by conv1's weight.  Zero rows/cols give exact zeros
    # outside the sampled window (-> bias only, matching the zero-padded conv).
    P_np = np.zeros((L, L), np.float32)
    for src, dst in _gather_pairs(S, S, 2, 10, S, S):
        P_np[src, dst] = 1.0
    Pw1 = jnp.asarray(P_np) * w1[0]                                  # (L, L)

    packed = jnp.concatenate([Xd, Wm, Pw1], axis=0)                  # (2L+8, L)

    out = pl.pallas_call(
        functools.partial(_fused_kernel, lane=L),
        out_shape=jax.ShapeDtypeStruct((2, L), jnp.float32),
        in_specs=[pl.BlockSpec(memory_space=pltpu.MemorySpace.VMEM)],
        out_specs=pl.BlockSpec(memory_space=pltpu.MemorySpace.VMEM),
    )(packed)

    return out[:, :sp].reshape(1, 2, S, S)


# --------------------------- pure-JAX reference --------------------------------

def _conv2d_ref(x, w, b, stride, padding):
    out = lax.conv_general_dilated(
        x, w, window_strides=(stride, stride),
        padding=[(padding, padding), (padding, padding)],
        dimension_numbers=('NCHW', 'OIHW', 'NCHW'),
        precision=lax.Precision.HIGHEST)
    if b is not None:
        out = out + b.reshape(1, -1, 1, 1)
    return out


def _align(tensors):
    """Top-left crop to common min spatial size, broadcast channels to the max."""
    hm = min(t.shape[2] for t in tensors)
    wm = min(t.shape[3] for t in tensors)
    cm = max(t.shape[1] for t in tensors)
    return [jnp.broadcast_to(t[:, :, :hm, :wm], (1, cm, hm, wm)) for t in tensors]


def model_ref(params, x):
    v1 = _conv2d_ref(x, params['conv_w'], None, 2, 20)
    v2 = _conv2d_ref(x, params['conv1_w'], params['conv1_b'], 2, 10)
    v3 = _conv2d_ref(x, params['conv2_w'], params['conv2_b'], 2, 2)
    v4 = _conv2d_ref(x, params['conv3_w'], params['conv3_b'], 2, 2)
    v5 = _conv2d_ref(x, params['conv4_w'], params['conv4_b'], 2, 2)
    v6 = _conv2d_ref(v5[:, :1], params['conv1_w'], params['conv1_b'], 2, 10)
    a1, a3, a4, a6 = _align([v1, v3, v4, v6])
    v7 = a1 + a3 + a4 + a6
    v8 = _conv2d_ref(v7[:, :1], params['conv1_w'], params['conv1_b'], 2, 10)
    b2, b7, b8 = _align([v2, v7, v8])
    v9 = b2 + b7 + b8
    v12 = (v9 * v9) * v9
    v15 = (v9 + v12 * 0.044715) * 0.7978845608028654
    return (v9 * 0.5) * (jnp.tanh(v15) + 1.0)


# ---------------------------------- main ---------------------------------------

def _init_conv(key, cout, cin, k, bias=True):
    kw_, kb_ = jax.random.split(key)
    bound = 1.0 / math.sqrt(cin * k * k)
    w = jax.random.uniform(kw_, (cout, cin, k, k), jnp.float32, -bound, bound)
    b = jax.random.uniform(kb_, (cout,), jnp.float32, -bound, bound) if bias else None
    return w, b


if __name__ == "__main__":
    keys = jax.random.split(jax.random.PRNGKey(0), 8)
    params = {}
    params['conv_w'], _ = _init_conv(keys[0], 1, 1, 1, bias=False)
    params['conv1_w'], params['conv1_b'] = _init_conv(keys[1], 1, 1, 1)
    params['conv2_w'], params['conv2_b'] = _init_conv(keys[2], 1, 1, 3)
    params['conv3_w'], params['conv3_b'] = _init_conv(keys[3], 2, 1, 3)
    params['conv4_w'], params['conv4_b'] = _init_conv(keys[4], 3, 1, 3)
    params['conv5_w'], params['conv5_b'] = _init_conv(keys[5], 4, 1, 3)  # defined but unused, as in the module

    x = jax.random.normal(keys[6], (1, 1, 16, 16), jnp.float32)

    fwd = jax.jit(model_forward)
    out = jax.block_until_ready(fwd(params, x))
    ref = model_ref(params, x)
    assert out.shape == ref.shape, (out.shape, ref.shape)
    assert jnp.allclose(out, ref, rtol=1e-4, atol=1e-4), float(jnp.max(jnp.abs(out - ref)))
    print("KERNEL_OK")
</pallas_src>

<mosaic_0001>
module attributes {stable_mosaic.version = 11 : i64} {
  func.func @_fused_kernel(%arg0: memref<264x128xf32, #tpu.memory_space<vmem>>, %arg1: memref<2x128xf32, #tpu.memory_space<vmem>>) attributes {dimension_semantics = [], scalar_prefetch = 0 : i64, scratch_operands = 0 : i64, tpu.core_type = #tpu.core_type<tc>} {
    %c0 = arith.constant 0 : index
    %c0_0 = arith.constant 0 : index
    %0 = vector.load %arg0[%c0, %c0_0] : memref<264x128xf32, #tpu.memory_space<vmem>>, vector<128x128xf32>
    %c128 = arith.constant 128 : index
    %c0_1 = arith.constant 0 : index
    %1 = vector.load %arg0[%c128, %c0_1] : memref<264x128xf32, #tpu.memory_space<vmem>>, vector<8x128xf32>
    %c136 = arith.constant 136 : index
    %c0_2 = arith.constant 0 : index
    %2 = vector.load %arg0[%c136, %c0_2] : memref<264x128xf32, #tpu.memory_space<vmem>>, vector<128x128xf32>
    %cst = arith.constant dense<0.000000e+00> : vector<8x128xf32>
    %3 = tpu.matmul %1, %0, %cst {dimension_numbers = #tpu.dot_dimension_numbers<[1], [0], [0], [1], [0, 0, 1, 1], [], []>, precision = #tpu.contract_precision<fp32>} : vector<8x128xf32>, vector<128x128xf32>, vector<8x128xf32> -> vector<8x128xf32>
    %4 = vector.extract_strided_slice %3 {offsets = [6, 0], sizes = [1, 128], strides = [1, 1]} : vector<8x128xf32> to vector<1x128xf32>
    %cst_3 = arith.constant dense<0.000000e+00> : vector<8x128xf32>
    %5 = tpu.matmul %3, %2, %cst_3 {dimension_numbers = #tpu.dot_dimension_numbers<[1], [0], [0], [1], [0, 0, 1, 1], [], []>, precision = #tpu.contract_precision<fp32>} : vector<8x128xf32>, vector<128x128xf32>, vector<8x128xf32> -> vector<8x128xf32>
    %6 = vector.extract_strided_slice %5 {offsets = [3, 0], sizes = [1, 128], strides = [1, 1]} : vector<8x128xf32> to vector<1x128xf32>
    %7 = arith.addf %6, %4 : vector<1x128xf32>
    %8 = vector.extract_strided_slice %3 {offsets = [0, 0], sizes = [1, 128], strides = [1, 1]} : vector<8x128xf32> to vector<1x128xf32>
    %9 = vector.extract_strided_slice %3 {offsets = [4, 0], sizes = [1, 128], strides = [1, 1]} : vector<8x128xf32> to vector<1x128xf32>
    %10 = arith.addf %8, %9 : vector<1x128xf32>
    %11 = arith.addf %10, %7 : vector<1x128xf32>
    %12 = vector.extract_strided_slice %3 {offsets = [1, 0], sizes = [2, 128], strides = [1, 1]} : vector<8x128xf32> to vector<2x128xf32>
    %13 = vector.broadcast %11 : vector<1x128xf32> to vector<2x128xf32>
    %14 = arith.addf %13, %12 : vector<2x128xf32>
    %cst_4 = arith.constant dense<0.000000e+00> : vector<2x128xf32>
    %15 = tpu.matmul %14, %2, %cst_4 {dimension_numbers = #tpu.dot_dimension_numbers<[1], [0], [0], [1], [0, 0, 1, 1], [], []>, precision = #tpu.contract_precision<fp32>} : vector<2x128xf32>, vector<128x128xf32>, vector<2x128xf32> -> vector<2x128xf32>
    %16 = vector.extract_strided_slice %15 {offsets = [0, 0], sizes = [1, 128], strides = [1, 1]} : vector<2x128xf32> to vector<1x128xf32>
    %17 = arith.addf %16, %4 : vector<1x128xf32>
    %18 = vector.extract_strided_slice %3 {offsets = [5, 0], sizes = [1, 128], strides = [1, 1]} : vector<8x128xf32> to vector<1x128xf32>
    %19 = arith.addf %18, %17 : vector<1x128xf32>
    %20 = vector.broadcast %19 : vector<1x128xf32> to vector<2x128xf32>
    %21 = arith.addf %20, %14 : vector<2x128xf32>
    %22 = arith.mulf %21, %21 : vector<2x128xf32>
    %23 = arith.mulf %22, %21 : vector<2x128xf32>
    %cst_5 = arith.constant 4.471500e-02 : f32
    %24 = vector.broadcast %cst_5 : f32 to vector<2x128xf32>
    %25 = arith.mulf %23, %24 : vector<2x128xf32>
    %26 = arith.addf %21, %25 : vector<2x128xf32>
    %cst_6 = arith.constant 0.797884583 : f32
    %27 = vector.broadcast %cst_6 : f32 to vector<2x128xf32>
    %28 = arith.mulf %26, %27 : vector<2x128xf32>
    %cst_7 = arith.constant 5.000000e-01 : f32
    %29 = vector.broadcast %cst_7 : f32 to vector<2x128xf32>
    %30 = arith.mulf %21, %29 : vector<2x128xf32>
    %31 = math.tanh %28 : vector<2x128xf32>
    %cst_8 = arith.constant 1.000000e+00 : f32
    %32 = vector.broadcast %cst_8 : f32 to vector<2x128xf32>
    %33 = arith.addf %31, %32 : vector<2x128xf32>
    %34 = arith.mulf %30, %33 : vector<2x128xf32>
    %c0_9 = arith.constant 0 : index
    %c0_10 = arith.constant 0 : index
    %35 = vector.load %arg1[%c0_9, %c0_10] : memref<2x128xf32, #tpu.memory_space<vmem>>, vector<2x128xf32>
    tpu.vector_store %arg1[%c0_9, %c0_10], %34 {strides = array<i32>} : memref<2x128xf32, #tpu.memory_space<vmem>>, vector<2x128xf32>,
    return
  }
}

</mosaic_0001>

<bundles_post_ra>
// kernel: model_forward.1
= control target key start
LH: loop header
LB: loop body
LE: loop exit
PB: predicated region body
PF: predicated region fallthrough
CT: control target
= control target key end

     0   :  { %v3392_v0 = vmov 0.0|0.0   ;;  %vm3393_vm0 = vmmov 0   ;;  %v3394_v4 = vmov 0.0   ;;  %s4285_s0 = inlined_call_operand.vmem [shape: f32[264,128], index: 0, kind: input, shape index: {}]   ;;  %s4286_s1 = inlined_call_operand.vmem [shape: f32[2,128], index: 1, kind: output, shape index: {}]  }
   0x1   :  { %2945 = vmatprep.subr.bf16.mxu0 %v3392_v0  ;;  %v8_v1 = vld [vmem:[%s4285_s0] sm:$0xff]  ;;  %v9_v2 = vld [vmem:[%s4285_s0 + $0x8] sm:$0xff]  ;;  %v10_v3 = vld [vmem:[%s4285_s0 + $0x10] sm:$0xff]  ;;  %2347 = vmatprep.mubr.msk.f32.mxu0 %vm3393_vm0, %v3394_v4 }
   0x2   :  { %v42_v5 = vand.u32 4294901760, %v8_v1  ;;  %v45_v6 = vand.u32 4294901760, %v9_v2  ;;  %v11_v7 = vld [vmem:[%s4285_s0 + $0x18] sm:$0xff]  ;;  %v48_v8 = vand.u32 4294901760, %v10_v3  ;;  %3089 = vmatprep.subr.bf16.mxu1 %v3392_v0  ;;  %2557 = vmatprep.mubr.msk.f32.mxu1 %vm3393_vm0, %v3394_v4  ;;  %v12_v10 = vld [vmem:[%s4285_s0 + $0x20] sm:$0xff]  ;;  %v13_v11 = vld [vmem:[%s4285_s0 + $0x28] sm:$0xff] }
   0x3   :  { %v51_v9 = vand.u32 4294901760, %v11_v7  ;;  %v54_v14 = vand.u32 4294901760, %v12_v10  ;;  %v57_v15 = vand.u32 4294901760, %v13_v11  ;;  %v14_v16 = vld [vmem:[%s4285_s0 + $0x30] sm:$0xff]  ;;  %v15_v17 = vld [vmem:[%s4285_s0 + $0x38] sm:$0xff]  ;;  %v16_v21 = vld [vmem:[%s4285_s0 + $0x40] sm:$0xff] }
   0x4   :  { %v3429_v12 = vpack.c.bf16 %v45_v6, %v42_v5  ;;  %v60_v19 = vand.u32 4294901760, %v14_v16  ;;  %v63_v20 = vand.u32 4294901760, %v15_v17  ;;  %v17_v22 = vld [vmem:[%s4285_s0 + $0x48] sm:$0xff]  ;;  %v24_v23 = vld [vmem:[%s4285_s0 + $0x80] sm:$0xff]  ;;  %v3454_v24 = vsub.f32 %v8_v1, %v42_v5  ;;  %v18_v29 = vld [vmem:[%s4285_s0 + $0x50] sm:$0xff] }
   0x5   :  { %v3432_v13 = vpack.c.bf16 %v51_v9, %v48_v8  ;;  %v3442_v18 = vpack.c.bf16 %v57_v15, %v54_v14  ;;  %v3456_v25 = vsub.f32 %v9_v2, %v45_v6  ;;  %v66_v27 = vand.u32 4294901760, %v16_v21  ;;  %v19_v30 = vld [vmem:[%s4285_s0 + $0x58] sm:$0xff]  ;;  %v20_v32 = vld [vmem:[%s4285_s0 + $0x60] sm:$0xff]  ;;  %v21_v35 = vld [vmem:[%s4285_s0 + $0x68] sm:$0xff] }
   0x6   :  { %2947 = vmatpush3.bf16.msra.mxu0 %v3429_v12  ;;  %v3459_v26 = vpack.c.bf16 %v63_v20, %v60_v19  ;;  %v69_v28 = vand.u32 4294901760, %v17_v22  ;;  %v3468_v31 = vand.u32 4294901760, %v24_v23  ;;  %v3473_v33 = vsub.f32 %v10_v3, %v48_v8  ;;  %v22_v36 = vld [vmem:[%s4285_s0 + $0x70] sm:$0xff]  ;;  %v23_v37 = vld [vmem:[%s4285_s0 + $0x78] sm:$0xff] }
   0x7   :  { %2948 = vmatprep.subr.bf16.mxu0 %v3392_v0  ;;  %v72_v34 = vand.u32 4294901760, %v18_v29  ;;  %v75_v39 = vand.u32 4294901760, %v19_v30  ;;  %v135_v40 = vand.u32 4294901760, %v3454_v24  ;;  %v142_v41 = vand.u32 4294901760, %v3456_v25 }
   0x8   :  { %v3485_v38 = vpack.c.bf16 %v69_v28, %v66_v27  ;;  %v3489_v42 = vsub.f32 %v11_v7, %v51_v9  ;;  %v3491_v43 = vsub.f32 %v12_v10, %v54_v14  ;;  %v3493_v44 = vsub.f32 %v13_v11, %v57_v15 }
   0x9   :  { %v3497_v45 = vsub.f32 %v24_v23, %v3468_v31  ;;  %v78_v46 = vand.u32 4294901760, %v20_v32  ;;  %v81_v47 = vand.u32 4294901760, %v21_v35  ;;  %v84_v48 = vand.u32 4294901760, %v22_v36 }
   0xa   :  { %2950 = vmatpush3.bf16.msra.mxu0 %v3432_v13  ;;  %v87_v49 = vand.u32 4294901760, %v23_v37  ;;  %v3499_v50 = vsub.f32 %v14_v16, %v60_v19  ;;  %v3501_v51 = vsub.f32 %v15_v17, %v63_v20  ;;  %v3503_v52 = vsub.f32 %v16_v21, %v66_v27 }
   0xb   :  { %2951 = vmatprep.subr.bf16.mxu0 %v3392_v0  ;;  %v149_v53 = vand.u32 4294901760, %v3473_v33  ;;  %v3507_v54 = vsub.f32 %v17_v22, %v69_v28  ;;  %v3509_v55 = vpack.c.bf16 %v75_v39, %v72_v34  ;;  %v136_v56 = vsub.f32 %v3454_v24, %v135_v40 }
   0xc   :  { %v143_v57 = vsub.f32 %v3456_v25, %v142_v41  ;;  %v3514_v58 = vsub.f32 %v18_v29, %v72_v34  ;;  %v3516_v59 = vsub.f32 %v19_v30, %v75_v39  ;;  %v3518_v60 = vsub.f32 %v20_v32, %v78_v46 }
   0xd   :  { %v124_v61 = vand.u32 4294901760, %v3497_v45  ;;  %v3521_v62 = vpack.c.bf16 %v81_v47, %v78_v46  ;;  %v3523_v63 = vsub.f32 %v21_v35, %v81_v47  ;;  %v3525_v1 = vpack.c.bf16 %v87_v49, %v84_v48 }
   0xe   :  { %2953 = vmatpush3.bf16.msra.mxu0 %v3442_v18  ;;  %v3527_v2 = vsub.f32 %v22_v36, %v84_v48  ;;  %v3529_v3 = vsub.f32 %v23_v37, %v87_v49  ;;  %v150_v5 = vsub.f32 %v3473_v33, %v149_v53  ;;  %v156_v6 = vand.u32 4294901760, %v3489_v42 }
   0xf   :  { %2954 = vmatprep.subr.bf16.mxu0 %v3392_v0  ;;  %v163_v7 = vand.u32 4294901760, %v3491_v43  ;;  %v137_v8 = vand.u32 4294901760, %v136_v56  ;;  %v144_v9 = vand.u32 4294901760, %v143_v57  ;;  %v170_v10 = vand.u32 4294901760, %v3493_v44 }
  0x10   :  { %v177_v11 = vand.u32 4294901760, %v3499_v50  ;;  %v125_v14 = vsub.f32 %v3497_v45, %v124_v61  ;;  %v184_v15 = vand.u32 4294901760, %v3501_v51  ;;  %v191_v16 = vand.u32 4294901760, %v3503_v52 }
  0x11   :  { %v198_v17 = vand.u32 4294901760, %v3507_v54  ;;  %v205_v19 = vand.u32 4294901760, %v3514_v58  ;;  %v212_v20 = vand.u32 4294901760, %v3516_v59  ;;  %v219_v21 = vand.u32 4294901760, %v3518_v60 }
  0x12   :  { %2956 = vmatpush3.bf16.msra.mxu0 %v3459_v26  ;;  %v226_v22 = vand.u32 4294901760, %v3523_v63  ;;  %v233_v23 = vand.u32 4294901760, %v3527_v2  ;;  %v240_v27 = vand.u32 4294901760, %v3529_v3  ;;  %v3550_v28 = vpack.c.bf16 %v142_v41, %v135_v40 }
  0x13   :  { %2957 = vmatprep.subr.bf16.mxu0 %v3392_v0  ;;  %v3552_v29 = vpack.c.bf16 %v156_v6, %v149_v53  ;;  %v157_v30 = vsub.f32 %v3489_v42, %v156_v6  ;;  %v3556_v32 = vpack.c.bf16 %v170_v10, %v163_v7  ;;  %v3558_v34 = vpack.c.bf16 %v184_v15, %v177_v11 }
  0x14   :  { %v3560_v35 = vpack.c.bf16 %v198_v17, %v191_v16  ;;  %v3563_v36 = vpack.c.bf16 %v212_v20, %v205_v19  ;;  %v3565_v37 = vpack.c.bf16 %v226_v22, %v219_v21  ;;  %v3567_v39 = vpack.c.bf16 %v240_v27, %v233_v23 }
  0x15   :  { %v126_v40 = vand.u32 4294901760, %v125_v14  ;;  %v151_v41 = vand.u32 4294901760, %v150_v5  ;;  %v2970_v46 = vpack.c.bf16 %v144_v9, %v137_v8  ;;  %v158_v47 = vand.u32 4294901760, %v157_v30 }
  0x16   :  { %2959 = vmatpush3.bf16.msra.mxu0 %v3485_v38  ;;  %v164_v48 = vsub.f32 %v3491_v43, %v163_v7  ;;  %v171_v49 = vsub.f32 %v3493_v44, %v170_v10  ;;  %v178_v53 = vsub.f32 %v3499_v50, %v177_v11  ;;  %v185_v14 = vsub.f32 %v3501_v51, %v184_v15 }
  0x17   :  { %2960 = vmatprep.subr.bf16.mxu0 %v3392_v0  ;;  %v2973_v56 = vpack.c.bf16 %v158_v47, %v151_v41  ;;  %v192_v5 = vsub.f32 %v3503_v52, %v191_v16  ;;  %v199_v10 = vsub.f32 %v3507_v54, %v198_v17  ;;  %v206_v15 = vsub.f32 %v3514_v58, %v205_v19 }
  0x18   :  { %v165_v57 = vand.u32 4294901760, %v164_v48  ;;  %v172_v6 = vand.u32 4294901760, %v171_v49  ;;  %v179_v8 = vand.u32 4294901760, %v178_v53  ;;  %v186_v9 = vand.u32 4294901760, %v185_v14 }
  0x19   :  { %v193_v11 = vand.u32 4294901760, %v192_v5  ;;  %v213_v41 = vsub.f32 %v3516_v59, %v212_v20  ;;  %v220_v16 = vsub.f32 %v3518_v60, %v219_v21  ;;  %v207_v47 = vand.u32 4294901760, %v206_v15  ;;  %v3609_v5 = vld [vmem:[%s4285_s0 + $0x98] sm:$0xff] }
  0x1a   :  { %2962 = vmatpush3.bf16.msra.mxu0 %v3509_v55  ;;  %v2976_v7 = vpack.c.bf16 %v172_v6, %v165_v57  ;;  %v2979_v30 = vpack.c.bf16 %v186_v9, %v179_v8  ;;  %v227_v17 = vsub.f32 %v3523_v63, %v226_v22  ;;  %v234_v19 = vsub.f32 %v3527_v2, %v233_v23  ;;  %v3599_v23 = vld [vmem:[%s4285_s0 + $0x88] sm:$0xff]  ;;  %v3620_v8 = vld [vmem:[%s4285_s0 + $0xa0] sm:$0xff] }
  0x1b   :  { %2963 = vmatprep.subr.bf16.mxu0 %v3392_v0  ;;  %v214_v48 = vand.u32 4294901760, %v213_v41  ;;  %v221_v49 = vand.u32 4294901760, %v220_v16  ;;  %v241_v20 = vsub.f32 %v3529_v3, %v240_v27  ;;  %v2994_v14 = vpack.c.bf16 %v3456_v25, %v3454_v24  ;;  %v3604_v27 = vld [vmem:[%s4285_s0 + $0x90] sm:$0xff] }
  0x1c   :  { %v235_v57 = vand.u32 4294901760, %v234_v19  ;;  %v2997_v24 = vpack.c.bf16 %v3489_v42, %v3473_v33  ;;  %v683_v25 = vand.u32 4294901760, %v3599_v23  ;;  %v689_v9 = vand.u32 4294901760, %v3609_v5  ;;  %v3628_v33 = vld [vmem:[%s4285_s0 + $0xa8] sm:$0xff]  ;;  %v3633_v42 = vld [vmem:[%s4285_s0 + $0xb0] sm:$0xff] }
  0x1d   :  { %v2985_v53 = vpack.c.bf16 %v214_v48, %v207_v47  ;;  %v242_v6 = vand.u32 4294901760, %v241_v20  ;;  %v695_v15 = vand.u32 4294901760, %v3628_v33  ;;  %v698_v41 = vand.u32 4294901760, %v3633_v42 }
  0x1e   :  { %2965 = vmatpush3.bf16.msra.mxu0 %v3521_v62  ;;  %v3003_v16 = vpack.c.bf16 %v3501_v51, %v3499_v50  ;;  %v3680_v50 = vld [vmem:[%s4285_s0 + $0xc8] sm:$0xff]  ;;  %v3685_v51 = vld [vmem:[%s4285_s0 + $0xd0] sm:$0xff]  ;;  %v3009_v19 = vpack.c.bf16 %v3516_v59, %v3514_v58  ;;  %v3012_v58 = vpack.c.bf16 %v3523_v63, %v3518_v60 }
  0x1f   :  { %2966 = vmatprep.subr.bf16.mxu0 %v3392_v0  ;;  %v2991_v22 = vpack.c.bf16 %v242_v6, %v235_v57  ;;  %v3015_v6 = vpack.c.bf16 %v3529_v3, %v3527_v2 }
  0x22   :  { %2968 = vmatpush3.bf16.msra.mxu0 %v3525_v1 }
  0x23   :  { %2969 = vmatprep.subr.bf16.mxu0 %v3392_v0 }
  0x25   :  { %2348 = vmatmul.mubr.f32.vlgmr.msra.gmra.mrb[0].mxu0 %v126_v40  ;;  %v200_v40 = vand.u32 4294901760, %v199_v10  ;;  %v692_v10 = vand.u32 4294901760, %v3620_v8 }
  0x26   :  { %2971 = vmatpush3.bf16.msra.mxu0 %v2970_v46  ;;  %2382 = vmatprep.mubr.msk.f32.mxu0 %vm3393_vm0, %v3394_v4 }
  0x27   :  { %2972 = vmatprep.subr.bf16.mxu0 %v3392_v0  ;;  %v2982_v46 = vpack.c.bf16 %v200_v40, %v193_v11  ;;  %v3648_v40 = vpack.c.bf16 %v692_v10, %v689_v9 }
  0x2a   :  { %2974 = vmatpush3.bf16.msra.mxu0 %v2973_v56  ;;  %v228_v56 = vand.u32 4294901760, %v227_v17  ;;  %v3006_v17 = vpack.c.bf16 %v3507_v54, %v3503_v52  ;;  %v3703_v52 = vld [vmem:[%s4285_s0 + $0xd8] sm:$0xff]  ;;  %v3708_v54 = vld [vmem:[%s4285_s0 + $0xe0] sm:$0xff] }
  0x2b   :  { %2975 = vmatprep.subr.bf16.mxu0 %v3392_v0  ;;  %v716_v57 = vand.u32 4294901760, %v3708_v54 }
  0x2c   :  { %v2988_v21 = vpack.c.bf16 %v228_v56, %v221_v49  ;;  %v710_v56 = vand.u32 4294901760, %v3685_v51 }
  0x2e   :  { %2977 = vmatpush3.bf16.msra.mxu0 %v2976_v7  ;;  %v686_v7 = vand.u32 4294901760, %v3604_v27 }
  0x2f   :  { %2978 = vmatprep.subr.bf16.mxu0 %v3392_v0 }
  0x30   :  { %v3639_v11 = vpack.c.bf16 %v686_v7, %v683_v25 }
  0x32   :  { %2980 = vmatpush3.bf16.msra.mxu0 %v2979_v30  ;;  %v3000_v30 = vpack.c.bf16 %v3493_v44, %v3491_v43  ;;  %3091 = vmatpush3.bf16.msra.mxu1 %v3639_v11  ;;  %v3657_v43 = vld [vmem:[%s4285_s0 + $0xb8] sm:$0xff]  ;;  %v3662_v44 = vld [vmem:[%s4285_s0 + $0xc0] sm:$0xff] }
  0x33   :  { %2981 = vmatprep.subr.bf16.mxu0 %v3392_v0  ;;  %3092 = vmatprep.subr.bf16.mxu1 %v3392_v0  ;;  %v701_v47 = vand.u32 4294901760, %v3657_v43  ;;  %v704_v48 = vand.u32 4294901760, %v3662_v44 }
  0x35   :  { %v3694_v49 = vpack.c.bf16 %v704_v48, %v701_v47 }
  0x36   :  { %2983 = vmatpush3.bf16.msra.mxu0 %v2982_v46  ;;  %3094 = vmatpush3.bf16.msra.mxu1 %v3648_v40  ;;  %v3671_v46 = vpack.c.bf16 %v698_v41, %v695_v15 }
  0x37   :  { %2984 = vmatprep.subr.bf16.mxu0 %v3392_v0  ;;  %3095 = vmatprep.subr.bf16.mxu1 %v3392_v0 }
  0x3a   :  { %2986 = vmatpush3.bf16.msra.mxu0 %v2985_v53  ;;  %3097 = vmatpush3.bf16.msra.mxu1 %v3671_v46  ;;  %v707_v53 = vand.u32 4294901760, %v3680_v50 }
  0x3b   :  { %2987 = vmatprep.subr.bf16.mxu0 %v3392_v0  ;;  %3098 = vmatprep.subr.bf16.mxu1 %v3392_v0 }
  0x3c   :  { %v3717_v20 = vpack.c.bf16 %v710_v56, %v707_v53 }
  0x3e   :  { %2989 = vmatpush3.bf16.msra.mxu0 %v2988_v21  ;;  %3100 = vmatpush3.bf16.msra.mxu1 %v3694_v49  ;;  %v713_v21 = vand.u32 4294901760, %v3703_v52 }
  0x3f   :  { %2990 = vmatprep.subr.bf16.mxu0 %v3392_v0  ;;  %3101 = vmatprep.subr.bf16.mxu1 %v3392_v0 }
  0x40   :  { %v3730_v59 = vpack.c.bf16 %v716_v57, %v713_v21 }
  0x42   :  { %2992 = vmatpush3.bf16.msra.mxu0 %v2991_v22  ;;  %3103 = vmatpush3.bf16.msra.mxu1 %v3717_v20 }
  0x43   :  { %2993 = vmatprep.subr.bf16.mxu0 %v3392_v0  ;;  %3104 = vmatprep.subr.bf16.mxu1 %v3392_v0 }
  0x45   :  { %2383 = vmatmul.mubr.f32.vlgmr.msra.gmra.mrb[0].mxu0 %v3468_v31 }
  0x46   :  { %2995 = vmatpush3.bf16.msra.mxu0 %v2994_v14  ;;  %2417 = vmatprep.mubr.msk.f32.mxu0 %vm3393_vm0, %v3394_v4 }
  0x47   :  { %2996 = vmatprep.subr.bf16.mxu0 %v3392_v0  ;;  %3106 = vmatpush3.bf16.msra.mxu1 %v3730_v59 }
  0x48   :  { %3107 = vmatprep.subr.bf16.mxu1 %v3392_v0 }
  0x4a   :  { %2998 = vmatpush3.bf16.msra.mxu0 %v2997_v24 }
  0x4b   :  { %2999 = vmatprep.subr.bf16.mxu0 %v3392_v0 }
  0x4e   :  { %3001 = vmatpush3.bf16.msra.mxu0 %v3000_v30 }
  0x4f   :  { %3002 = vmatprep.subr.bf16.mxu0 %v3392_v0 }
  0x52   :  { %3004 = vmatpush3.bf16.msra.mxu0 %v3003_v16 }
  0x53   :  { %3005 = vmatprep.subr.bf16.mxu0 %v3392_v0 }
  0x56   :  { %3007 = vmatpush3.bf16.msra.mxu0 %v3006_v17 }
  0x57   :  { %3008 = vmatprep.subr.bf16.mxu0 %v3392_v0 }
  0x5a   :  { %3010 = vmatpush3.bf16.msra.mxu0 %v3009_v19 }
  0x5b   :  { %3011 = vmatprep.subr.bf16.mxu0 %v3392_v0 }
  0x5e   :  { %3013 = vmatpush3.bf16.msra.mxu0 %v3012_v58  ;;  %v3876_v58 = vsub.f32 %v3599_v23, %v683_v25 }
  0x5f   :  { %3014 = vmatprep.subr.bf16.mxu0 %v3392_v0 }
  0x62   :  { %3016 = vmatpush3.bf16.msra.mxu0 %v3015_v6  ;;  %v3881_v6 = vsub.f32 %v3604_v27, %v686_v7  ;;  %v3900_v27 = vsub.f32 %v3628_v33, %v695_v15 }
  0x63   :  { %3017 = vmatprep.subr.bf16.mxu0 %v3392_v0 }
  0x64   :  { %v783_v23 = vand.u32 4294901760, %v3881_v6  ;;  %v804_v15 = vand.u32 4294901760, %v3900_v27 }
  0x65   :  { %2418 = vmatmul.mubr.f32.vlgmr.msra.gmra.mrb[0].mxu0 %v3497_v45  ;;  %v40_v45 = vld [vmem:[%s4285_s0 + $0x100] sm:$0xff] }
  0x66   :  { %3019 = vmatpush3.bf16.msra.mxu0 %v3429_v12  ;;  %2452 = vmatprep.mubr.msk.f32.mxu0 %vm3393_vm0, %v3394_v4  ;;  %v728_v60 = vand.u32 4294901760, %v40_v45 }
  0x67   :  { %3020 = vmatprep.subr.bf16.mxu0 %v3392_v0 }
  0x6a   :  { %3022 = vmatpush3.bf16.msra.mxu0 %v3432_v13 }
  0x6b   :  { %3023 = vmatprep.subr.bf16.mxu0 %v3392_v0 }
  0x6e   :  { %3025 = vmatpush3.bf16.msra.mxu0 %v3442_v18 }
  0x6f   :  { %3026 = vmatprep.subr.bf16.mxu0 %v3392_v0 }
  0x72   :  { %3028 = vmatpush3.bf16.msra.mxu0 %v3459_v26 }
  0x73   :  { %3029 = vmatprep.subr.bf16.mxu0 %v3392_v0 }
  0x76   :  { %3031 = vmatpush3.bf16.msra.mxu0 %v3485_v38 }
  0x77   :  { %3032 = vmatprep.subr.bf16.mxu0 %v3392_v0 }
  0x7a   :  { %3034 = vmatpush3.bf16.msra.mxu0 %v3509_v55 }
  0x7b   :  { %3035 = vmatprep.subr.bf16.mxu0 %v3392_v0 }
  0x7e   :  { %3037 = vmatpush3.bf16.msra.mxu0 %v3521_v62 }
  0x7f   :  { %3038 = vmatprep.subr.bf16.mxu0 %v3392_v0 }
  0x82   :  { %3040 = vmatpush3.bf16.msra.mxu0 %v3525_v1 }
  0x83   :  { %3041 = vmatprep.subr.bf16.mxu0 %v3392_v0 }
  0x85   :  { %2453 = vmatmul.mubr.f32.vlgmr.msra.gmra.mrb[0].mxu0 %v124_v61 }
  0x86   :  { %3043 = vmatpush3.bf16.msra.mxu0 %v3550_v28  ;;  %2487 = vmatprep.mubr.msk.f32.mxu0 %vm3393_vm0, %v3394_v4 }
  0x87   :  { %3044 = vmatprep.subr.bf16.mxu0 %v3392_v0 }
  0x8a   :  { %3046 = vmatpush3.bf16.msra.mxu0 %v3552_v29  ;;  %v3848_v29 = vsub.f32 %v40_v45, %v728_v60 }
  0x8b   :  { %3047 = vmatprep.subr.bf16.mxu0 %v3392_v0 }
  0x8e   :  { %3049 = vmatpush3.bf16.msra.mxu0 %v3556_v32 }
  0x8f   :  { %3050 = vmatprep.subr.bf16.mxu0 %v3392_v0 }
  0x92   :  { %3052 = vmatpush3.bf16.msra.mxu0 %v3558_v34 }
  0x93   :  { %3053 = vmatprep.subr.bf16.mxu0 %v3392_v0 }
  0x96   :  { %3055 = vmatpush3.bf16.msra.mxu0 %v3560_v35 }
  0x97   :  { %3056 = vmatprep.subr.bf16.mxu0 %v3392_v0 }
  0x9a   :  { %3058 = vmatpush3.bf16.msra.mxu0 %v3563_v36  ;;  %v881_v36 = vand.u32 4294901760, %v3848_v29 }
  0x9b   :  { %3059 = vmatprep.subr.bf16.mxu0 %v3392_v0 }
  0x9c   :  { %v882_v22 = vsub.f32 %v3848_v29, %v881_v36 }
  0x9e   :  { %3061 = vmatpush3.bf16.msra.mxu0 %v3565_v37  ;;  %v883_v30 = vand.u32 4294901760, %v882_v22  ;;  %v805_v22 = vsub.f32 %v3900_v27, %v804_v15 }
  0x9f   :  { %3062 = vmatprep.subr.bf16.mxu0 %v3392_v0 }
  0xa2   :  { %3064 = vmatpush3.bf16.msra.mxu0 %v3567_v39 }
  0xa3   :  { %3065 = vmatprep.subr.bf16.mxu0 %v3392_v0 }
  0xa5   :  { %2488 = vmatmul.mubr.f32.vlgmr.msra.gmra.mrb[0].mxu0 %v3468_v31 }
  0xa6   :  { %3067 = vmatpush3.bf16.msra.mxu0 %v3429_v12  ;;  %2522 = vmatprep.mubr.msk.f32.mxu0 %vm3393_vm0, %v3394_v4  ;;  %v37_v12 = vld [vmem:[%s4285_s0 + $0xe8] sm:$0xff] }
  0xa7   :  { %3068 = vmatprep.subr.bf16.mxu0 %v3392_v0 }
  0xaa   :  { %3070 = vmatpush3.bf16.msra.mxu0 %v3432_v13  ;;  %v38_v13 = vld [vmem:[%s4285_s0 + $0xf0] sm:$0xff] }
  0xab   :  { %3071 = vmatprep.subr.bf16.mxu0 %v3392_v0 }
  0xae   :  { %3073 = vmatpush3.bf16.msra.mxu0 %v3442_v18  ;;  %v719_v18 = vand.u32 4294901760, %v37_v12 }
  0xaf   :  { %3074 = vmatprep.subr.bf16.mxu0 %v3392_v0 }
  0xb2   :  { %3076 = vmatpush3.bf16.msra.mxu0 %v3459_v26  ;;  %v722_v26 = vand.u32 4294901760, %v38_v13 }
  0xb3   :  { %3077 = vmatprep.subr.bf16.mxu0 %v3392_v0 }
  0xb4   :  { %v3839_v63 = vsub.f32 %v38_v13, %v722_v26  ;;  %v3891_v13 = vsub.f32 %v3620_v8, %v692_v10 }
  0xb6   :  { %3079 = vmatpush3.bf16.msra.mxu0 %v3485_v38  ;;  %v39_v38 = vld [vmem:[%s4285_s0 + $0xf8] sm:$0xff]  ;;  %v867_v2 = vand.u32 4294901760, %v3839_v63 }
  0xb7   :  { %3080 = vmatprep.subr.bf16.mxu0 %v3392_v0 }
  0xb8   :  { %v868_v32 = vsub.f32 %v3839_v63, %v867_v2 }
  0xba   :  { %3082 = vmatpush3.bf16.msra.mxu0 %v3509_v55  ;;  %v725_v55 = vand.u32 4294901760, %v39_v38  ;;  %v869_v37 = vand.u32 4294901760, %v868_v32 }
  0xbb   :  { %3083 = vmatprep.subr.bf16.mxu0 %v3392_v0 }
  0xbc   :  { %v3830_v61 = vpack.c.bf16 %v728_v60, %v725_v55  ;;  %v3846_v28 = vsub.f32 %v39_v38, %v725_v55  ;;  %v3933_v55 = vsub.f32 %v3657_v43, %v701_v47  ;;  %v3938_v60 = vsub.f32 %v3662_v44, %v704_v48 }
  0xbe   :  { %3085 = vmatpush3.bf16.msra.mxu0 %v3521_v62  ;;  %v3837_v62 = vsub.f32 %v37_v12, %v719_v18  ;;  %v874_v35 = vand.u32 4294901760, %v3846_v28  ;;  %v3871_v19 = vpack.c.bf16 %v3848_v29, %v3846_v28  ;;  %v3886_v12 = vsub.f32 %v3609_v5, %v689_v9 }
  0xbf   :  { %3086 = vmatprep.subr.bf16.mxu0 %v3392_v0  ;;  %v3905_v5 = vsub.f32 %v3633_v42, %v698_v41  ;;  %v784_v9 = vsub.f32 %v3881_v6, %v783_v23  ;;  %v818_v44 = vand.u32 4294901760, %v3933_v55  ;;  %v825_v48 = vand.u32 4294901760, %v3938_v60 }
  0xc0   :  { %v875_v39 = vsub.f32 %v3846_v28, %v874_v35  ;;  %v3867_v17 = vpack.c.bf16 %v3839_v63, %v3837_v62  ;;  %v790_v25 = vand.u32 4294901760, %v3886_v12 }
  0xc1   :  { %v811_v45 = vand.u32 4294901760, %v3905_v5  ;;  %v785_v32 = vand.u32 4294901760, %v784_v9 }
  0xc2   :  { %3088 = vmatpush3.bf16.msra.mxu0 %v3525_v1  ;;  %v860_v1 = vand.u32 4294901760, %v3837_v62  ;;  %v876_v24 = vand.u32 4294901760, %v875_v39  ;;  %v791_v33 = vsub.f32 %v3886_v12, %v790_v25 }
  0xc3   :  { %3233 = vmatprep.subr.bf16.mxu0 %v3392_v0  ;;  %v812_v47 = vsub.f32 %v3905_v5, %v811_v45 }
  0xc4   :  { %v861_v3 = vsub.f32 %v3837_v62, %v860_v1  ;;  %v3863_v16 = vpack.c.bf16 %v883_v30, %v876_v24  ;;  %v3957_v30 = vsub.f32 %v3680_v50, %v707_v53  ;;  %v826_v50 = vsub.f32 %v3938_v60, %v825_v48 }
  0xc5   :  { %2523 = vmatmul.mubr.f32.vlgmr.msra.gmra.mrb[0].mxu0 %v3468_v31  ;;  %v3819_v31 = vpack.c.bf16 %v722_v26, %v719_v18  ;;  %v776_v18 = vand.u32 4294901760, %v3876_v58  ;;  %v797_v26 = vand.u32 4294901760, %v3891_v13 }
  0xc6   :  { %3235 = vmatpush3.bf16.msra.mxu0 %v3639_v11  ;;  %2767 = vmatprep.mubr.msk.f32.mxu0 %vm3393_vm0, %v3394_v4  ;;  %v862_v34 = vand.u32 4294901760, %v861_v3  ;;  %v832_v53 = vand.u32 4294901760, %v3957_v30 }
  0xc7   :  { %3236 = vmatprep.subr.bf16.mxu0 %v3392_v0  ;;  %3109 = vmatpush3.bf16.msra.mxu1 %v3819_v31  ;;  %v777_v8 = vsub.f32 %v3876_v58, %v776_v18  ;;  %v798_v42 = vsub.f32 %v3891_v13, %v797_v26 }
  0xc8   :  { %3110 = vmatprep.subr.bf16.mxu1 %v3392_v0  ;;  %v3861_v14 = vpack.c.bf16 %v869_v37, %v862_v34  ;;  %v792_v37 = vand.u32 4294901760, %v791_v33  ;;  %v806_v33 = vand.u32 4294901760, %v805_v22  ;;  %v827_v22 = vand.u32 4294901760, %v826_v50 }
  0xc9   :  { %v778_v3 = vand.u32 4294901760, %v777_v8  ;;  %v799_v39 = vand.u32 4294901760, %v798_v42  ;;  %v3962_v8 = vsub.f32 %v3685_v51, %v710_v56  ;;  %v813_v42 = vand.u32 4294901760, %v812_v47 }
  0xca   :  { %3238 = vmatpush3.bf16.msra.mxu0 %v3648_v40  ;;  %v3978_v56 = vsub.f32 %v3703_v52, %v713_v21  ;;  %v833_v52 = vsub.f32 %v3957_v30, %v832_v53 }
  0xcb   :  { %3239 = vmatprep.subr.bf16.mxu0 %v3392_v0  ;;  %3112 = vmatpush3.bf16.msra.mxu1 %v3830_v61  ;;  %v3952_v24 = vpack.c.bf16 %v785_v32, %v778_v3  ;;  %v819_v3 = vsub.f32 %v3933_v55, %v818_v44  ;;  %v839_v51 = vand.u32 4294901760, %v3962_v8  ;;  %v3983_v32 = vsub.f32 %v3708_v54, %v716_v57 }
  0xcc   :  { %3113 = vmatprep.subr.bf16.mxu1 %v3392_v0  ;;  %v846_v21 = vand.u32 4294901760, %v3978_v56  ;;  %v834_v47 = vand.u32 4294901760, %v833_v52  ;;  %v4025_v52 = vpack.c.bf16 %v3881_v6, %v3876_v58  ;;  %v4109_v58 = vpack.c.bf16 %v811_v45, %v804_v15 }
  0xcd   :  { %v840_v54 = vsub.f32 %v3962_v8, %v839_v51  ;;  %v853_v57 = vand.u32 4294901760, %v3983_v32  ;;  %v4117_v6 = vpack.c.bf16 %v825_v48, %v818_v44  ;;  %v1334_v15 = vlaneseq }
  0xce   :  { %3241 = vmatpush3.bf16.msra.mxu0 %v3671_v46 }
  0xcf   :  { %3242 = vmatprep.subr.bf16.mxu0 %v3392_v0 }
  0xd2   :  { %3244 = vmatpush3.bf16.msra.mxu0 %v3694_v49 }
  0xd3   :  { %3245 = vmatprep.subr.bf16.mxu0 %v3392_v0 }
  0xd6   :  { %3247 = vmatpush3.bf16.msra.mxu0 %v3717_v20 }
  0xd7   :  { %3248 = vmatprep.subr.bf16.mxu0 %v3392_v0 }
  0xda   :  { %3250 = vmatpush3.bf16.msra.mxu0 %v3730_v59 }
  0xdb   :  { %3251 = vmatprep.subr.bf16.mxu0 %v3392_v0 }
  0xde   :  { %3253 = vmatpush3.bf16.msra.mxu0 %v3819_v31 }
  0xdf   :  { %3254 = vmatprep.subr.bf16.mxu0 %v3392_v0 }
  0xe2   :  { %3256 = vmatpush3.bf16.msra.mxu0 %v3830_v61 }
  0xe3   :  { %3281 = vmatprep.subr.bf16.mxu0 %v3392_v0 }
 0x198   :  { %v3907_v7 = vpop.f32.mrb[0].mxu0 }
 0x199   :  { %v2524_v10 = vpop.f32.mrb[1].mxu0  ;;  %v3916_v38 = vand.u32 4294901760, %v3907_v7 }
 0x19a   :  { %v3964_v10 = vpack.c.bf16 %v799_v39, %v792_v37  ;;  %v3988_v37 = vpack.c.bf16 %v813_v42, %v806_v33  ;;  %v820_v39 = vand.u32 4294901760, %v819_v3  ;;  %v847_v33 = vsub.f32 %v3978_v56, %v846_v21 }
 0x19b   :  { %v3927_v41 = vsub.f32 %v3907_v7, %v3916_v38  ;;  %v854_v42 = vsub.f32 %v3983_v32, %v853_v57 }
 0x19c   :  { %v848_v50 = vand.u32 4294901760, %v847_v33  ;;  %v4052_v33 = vpack.c.bf16 %v3962_v8, %v3957_v30 }
 0x19d   :  { %v765_v34 = vand.u32 4294901760, %v3927_v41 }
 0x19f   :  { %v766_v43 = vsub.f32 %v3927_v41, %v765_v34 }
 0x1a1   :  { %v767_v9 = vand.u32 4294901760, %v766_v43  ;;  %v4000_v43 = vpack.c.bf16 %v827_v22, %v820_v39  ;;  %v855_v39 = vand.u32 4294901760, %v854_v42  ;;  %v4058_v42 = vpack.c.bf16 %v3983_v32, %v3978_v56 }
 0x1a3   :  { %2558 = vmatmul.mubr.f32.vlgmr.msra.gmra.mrb[0].mxu1 %v767_v9  ;;  %v841_v9 = vand.u32 4294901760, %v840_v54  ;;  %v4015_v22 = vpack.c.bf16 %v855_v39, %v848_v50  ;;  %v4032_v54 = vpack.c.bf16 %v3891_v13, %v3886_v12  ;;  %v4089_v50 = vpack.c.bf16 %v783_v23, %v776_v18 }
 0x1a4   :  { %3115 = vmatpush3.bf16.msra.mxu1 %v3952_v24  ;;  %2592 = vmatprep.mubr.msk.f32.mxu1 %vm3393_vm0, %v3394_v4  ;;  %v4099_v39 = vpack.c.bf16 %v797_v26, %v790_v25  ;;  %v4125_v12 = vpack.c.bf16 %v839_v51, %v832_v53  ;;  %v4133_v13 = vpack.c.bf16 %v853_v57, %v846_v21 }
 0x1a5   :  { %3116 = vmatprep.subr.bf16.mxu1 %v3392_v0  ;;  %v4011_v3 = vpack.c.bf16 %v841_v9, %v834_v47  ;;  %v4040_v47 = vpack.c.bf16 %v3905_v5, %v3900_v27  ;;  %v4046_v9 = vpack.c.bf16 %v3938_v60, %v3933_v55  ;;  %v4141_v18 = vpack.c.bf16 %v867_v2, %v860_v1 }
 0x1a6   :  { %v4149_v23 = vpack.c.bf16 %v881_v36, %v874_v35  ;;  %v1327_v55 = vrot.slane %v3907_v7, 4  ;;  %v4194_v60 = vshrl.u32 %v1334_v15, 7 }
 0x1a8   :  { %3118 = vmatpush3.bf16.msra.mxu1 %v3964_v10  ;;  %v1329_v48 = vadd.f32 %v1327_v55, %v3907_v7  ;;  %v1336_v30 = vsub.s32 0, %v4194_v60 }
 0x1a9   :  { %3119 = vmatprep.subr.bf16.mxu1 %v3392_v0 }
 0x1ac   :  { %3121 = vmatpush3.bf16.msra.mxu1 %v3988_v37 }
 0x1ad   :  { %3122 = vmatprep.subr.bf16.mxu1 %v3392_v0 }
 0x1b0   :  { %3124 = vmatpush3.bf16.msra.mxu1 %v4000_v43 }
 0x1b1   :  { %3125 = vmatprep.subr.bf16.mxu1 %v3392_v0 }
 0x1b4   :  { %3127 = vmatpush3.bf16.msra.mxu1 %v4011_v3 }
 0x1b5   :  { %3128 = vmatprep.subr.bf16.mxu1 %v3392_v0 }
 0x1b8   :  { %3130 = vmatpush3.bf16.msra.mxu1 %v4015_v22 }
 0x1b9   :  { %3131 = vmatprep.subr.bf16.mxu1 %v3392_v0 }
 0x1bc   :  { %3133 = vmatpush3.bf16.msra.mxu1 %v3861_v14 }
 0x1bd   :  { %3134 = vmatprep.subr.bf16.mxu1 %v3392_v0 }
 0x1c0   :  { %3136 = vmatpush3.bf16.msra.mxu1 %v3863_v16 }
 0x1c1   :  { %3137 = vmatprep.subr.bf16.mxu1 %v3392_v0 }
 0x1c3   :  { %2593 = vmatmul.mubr.f32.vlgmr.msra.gmra.mrb[2].mxu1 %v3916_v38 }
 0x1c4   :  { %3139 = vmatpush3.bf16.msra.mxu1 %v4025_v52  ;;  %2627 = vmatprep.mubr.msk.f32.mxu1 %vm3393_vm0, %v3394_v4 }
 0x1c5   :  { %3140 = vmatprep.subr.bf16.mxu1 %v3392_v0 }
 0x1c8   :  { %3142 = vmatpush3.bf16.msra.mxu1 %v4032_v54 }
 0x1c9   :  { %3143 = vmatprep.subr.bf16.mxu1 %v3392_v0 }
 0x1cc   :  { %3145 = vmatpush3.bf16.msra.mxu1 %v4040_v47 }
 0x1cd   :  { %3146 = vmatprep.subr.bf16.mxu1 %v3392_v0 }
 0x1d0   :  { %3148 = vmatpush3.bf16.msra.mxu1 %v4046_v9 }
 0x1d1   :  { %3149 = vmatprep.subr.bf16.mxu1 %v3392_v0 }
 0x1d4   :  { %3151 = vmatpush3.bf16.msra.mxu1 %v4052_v33 }
 0x1d5   :  { %3152 = vmatprep.subr.bf16.mxu1 %v3392_v0 }
 0x1d8   :  { %3154 = vmatpush3.bf16.msra.mxu1 %v4058_v42 }
 0x1d9   :  { %3155 = vmatprep.subr.bf16.mxu1 %v3392_v0 }
 0x1dc   :  { %3157 = vmatpush3.bf16.msra.mxu1 %v3867_v17 }
 0x1dd   :  { %3158 = vmatprep.subr.bf16.mxu1 %v3392_v0 }
 0x1e0   :  { %3160 = vmatpush3.bf16.msra.mxu1 %v3871_v19 }
 0x1e1   :  { %3161 = vmatprep.subr.bf16.mxu1 %v3392_v0 }
 0x1e3   :  { %2628 = vmatmul.mubr.f32.vlgmr.msra.gmra.mrb[4].mxu1 %v3927_v41 }
 0x1e4   :  { %3163 = vmatpush3.bf16.msra.mxu1 %v3639_v11  ;;  %2662 = vmatprep.mubr.msk.f32.mxu1 %vm3393_vm0, %v3394_v4 }
 0x1e5   :  { %3164 = vmatprep.subr.bf16.mxu1 %v3392_v0 }
 0x1e8   :  { %3166 = vmatpush3.bf16.msra.mxu1 %v3648_v40 }
 0x1e9   :  { %3167 = vmatprep.subr.bf16.mxu1 %v3392_v0 }
 0x1ec   :  { %3169 = vmatpush3.bf16.msra.mxu1 %v3671_v46 }
 0x1ed   :  { %3170 = vmatprep.subr.bf16.mxu1 %v3392_v0 }
 0x1f0   :  { %3172 = vmatpush3.bf16.msra.mxu1 %v3694_v49 }
 0x1f1   :  { %3173 = vmatprep.subr.bf16.mxu1 %v3392_v0 }
 0x1f4   :  { %3175 = vmatpush3.bf16.msra.mxu1 %v3717_v20 }
 0x1f5   :  { %3176 = vmatprep.subr.bf16.mxu1 %v3392_v0 }
 0x1f8   :  { %3178 = vmatpush3.bf16.msra.mxu1 %v3730_v59 }
 0x1f9   :  { %3179 = vmatprep.subr.bf16.mxu1 %v3392_v0 }
 0x1fc   :  { %3181 = vmatpush3.bf16.msra.mxu1 %v3819_v31 }
 0x1fd   :  { %3182 = vmatprep.subr.bf16.mxu1 %v3392_v0 }
 0x200   :  { %3184 = vmatpush3.bf16.msra.mxu1 %v3830_v61 }
 0x201   :  { %3185 = vmatprep.subr.bf16.mxu1 %v3392_v0 }
 0x203   :  { %2663 = vmatmul.mubr.f32.vlgmr.msra.gmra.mrb[6].mxu1 %v765_v34 }
 0x204   :  { %3187 = vmatpush3.bf16.msra.mxu1 %v4089_v50  ;;  %2697 = vmatprep.mubr.msk.f32.mxu1 %vm3393_vm0, %v3394_v4 }
 0x205   :  { %3188 = vmatprep.subr.bf16.mxu1 %v3392_v0 }
 0x208   :  { %3190 = vmatpush3.bf16.msra.mxu1 %v4099_v39 }
 0x209   :  { %3191 = vmatprep.subr.bf16.mxu1 %v3392_v0 }
 0x20c   :  { %3193 = vmatpush3.bf16.msra.mxu1 %v4109_v58 }
 0x20d   :  { %3194 = vmatprep.subr.bf16.mxu1 %v3392_v0 }
 0x210   :  { %3196 = vmatpush3.bf16.msra.mxu1 %v4117_v6 }
 0x211   :  { %3197 = vmatprep.subr.bf16.mxu1 %v3392_v0 }
 0x214   :  { %3199 = vmatpush3.bf16.msra.mxu1 %v4125_v12 }
 0x215   :  { %3200 = vmatprep.subr.bf16.mxu1 %v3392_v0 }
 0x218   :  { %3202 = vmatpush3.bf16.msra.mxu1 %v4133_v13 }
 0x219   :  { %3203 = vmatprep.subr.bf16.mxu1 %v3392_v0 }
 0x21c   :  { %3205 = vmatpush3.bf16.msra.mxu1 %v4141_v18 }
 0x21d   :  { %3206 = vmatprep.subr.bf16.mxu1 %v3392_v0 }
 0x220   :  { %3208 = vmatpush3.bf16.msra.mxu1 %v4149_v23 }
 0x221   :  { %3209 = vmatprep.subr.bf16.mxu1 %v3392_v0 }
 0x223   :  { %2698 = vmatmul.mubr.f32.vlgmr.msra.gmra.mrb[8].mxu1 %v3916_v38 }
 0x224   :  { %3211 = vmatpush3.bf16.msra.mxu1 %v3639_v11  ;;  %2732 = vmatprep.mubr.msk.f32.mxu1 %vm3393_vm0, %v3394_v4 }
 0x225   :  { %3212 = vmatprep.subr.bf16.mxu1 %v3392_v0 }
 0x228   :  { %3214 = vmatpush3.bf16.msra.mxu1 %v3648_v40 }
 0x229   :  { %3215 = vmatprep.subr.bf16.mxu1 %v3392_v0 }
 0x22c   :  { %3217 = vmatpush3.bf16.msra.mxu1 %v3671_v46 }
 0x22d   :  { %3218 = vmatprep.subr.bf16.mxu1 %v3392_v0 }
 0x230   :  { %3220 = vmatpush3.bf16.msra.mxu1 %v3694_v49 }
 0x231   :  { %3221 = vmatprep.subr.bf16.mxu1 %v3392_v0 }
 0x234   :  { %3223 = vmatpush3.bf16.msra.mxu1 %v3717_v20 }
 0x235   :  { %3224 = vmatprep.subr.bf16.mxu1 %v3392_v0 }
 0x238   :  { %3226 = vmatpush3.bf16.msra.mxu1 %v3730_v59 }
 0x239   :  { %3227 = vmatprep.subr.bf16.mxu1 %v3392_v0 }
 0x23c   :  { %3229 = vmatpush3.bf16.msra.mxu1 %v3819_v31 }
 0x23d   :  { %3230 = vmatprep.subr.bf16.mxu1 %v3392_v0 }
 0x240   :  { %3232 = vmatpush3.bf16.msra.mxu1 %v3830_v61 }
 0x241   :  { %3257 = vmatprep.subr.bf16.mxu1 %v3392_v0 }
 0x243   :  { %2733 = vmatmul.mubr.f32.vlgmr.msra.gmra.mrb[10].mxu1 %v3916_v38 }
 0x244   :  { %3259 = vmatpush3.bf16.msra.mxu1 %v3952_v24  ;;  %2802 = vmatprep.mubr.msk.f32.mxu1 %vm3393_vm0, %v3394_v4 }
 0x245   :  { %3260 = vmatprep.subr.bf16.mxu1 %v3392_v0 }
 0x248   :  { %3262 = vmatpush3.bf16.msra.mxu1 %v3964_v10 }
 0x249   :  { %3263 = vmatprep.subr.bf16.mxu1 %v3392_v0 }
 0x24c   :  { %3265 = vmatpush3.bf16.msra.mxu1 %v3988_v37 }
 0x24d   :  { %3266 = vmatprep.subr.bf16.mxu1 %v3392_v0 }
 0x250   :  { %3268 = vmatpush3.bf16.msra.mxu1 %v4000_v43 }
 0x251   :  { %3269 = vmatprep.subr.bf16.mxu1 %v3392_v0 }
 0x254   :  { %3271 = vmatpush3.bf16.msra.mxu1 %v4011_v3 }
 0x255   :  { %3272 = vmatprep.subr.bf16.mxu1 %v3392_v0 }
 0x258   :  { %3274 = vmatpush3.bf16.msra.mxu1 %v4015_v22 }
 0x259   :  { %3275 = vmatprep.subr.bf16.mxu1 %v3392_v0 }
 0x25c   :  { %3277 = vmatpush3.bf16.msra.mxu1 %v3861_v14 }
 0x25d   :  { %3278 = vmatprep.subr.bf16.mxu1 %v3392_v0 }
 0x260   :  { %3280 = vmatpush3.bf16.msra.mxu1 %v3863_v16  ;;  %v1324_v16 = vrot.slane %v3907_v7, 3 }
 0x261   :  { %3305 = vmatprep.subr.bf16.mxu1 %v3392_v0 }
 0x276   :  { %v769_v62 = vpop.f32.mrb[0].mxu1 }
 0x277   :  { %v2559_v63 = vpop.f32.mrb[1].mxu1 }
 0x296   :  { %v920_v1 = vpop.f32.mrb[2].mxu1 }
 0x297   :  { %v921_v2 = vadd.f32 %v920_v1, %v769_v62  ;;  %v2594_v28 = vpop.f32.mrb[3].mxu1 }
 0x2b6   :  { %v1024_v29 = vpop.f32.mrb[4].mxu1 }
 0x2b7   :  { %v1025_v35 = vadd.f32 %v1024_v29, %v921_v2  ;;  %v2629_v36 = vpop.f32.mrb[5].mxu1 }
 0x2d6   :  { %v1113_v25 = vpop.f32.mrb[6].mxu1 }
 0x2d7   :  { %v1114_v26 = vadd.f32 %v1113_v25, %v1025_v35  ;;  %v2664_v27 = vpop.f32.mrb[7].mxu1 }
 0x2f6   :  { %v1232_v5 = vpop.f32.mrb[8].mxu1 }
 0x2f7   :  { %v1233_v38 = vadd.f32 %v1232_v5, %v1114_v26  ;;  %v2699_v14 = vpop.f32.mrb[9].mxu1 }
 0x316   :  { %v1319_v41 = vpop.f32.mrb[10].mxu1 }
 0x317   :  { %v1320_v45 = vadd.f32 %v1319_v41, %v1233_v38  ;;  %v2734_v34 = vpop.f32.mrb[11].mxu1 }
 0x319   :  { %v1326_v44 = vadd.f32 %v1324_v16, %v1320_v45 }
 0x31b   :  { %v1331_v24 = vrot.slane %v1326_v44, 3 }
 0x31d   :  { %v1333_v8 = vadd.f32 %v1331_v24, %v1329_v48 }
 0x31f   :  { %v1337_v10 = vrot.slane %v1333_v8, %v1336_v30 }
 0x321   :  { %v4199_v53 = vadd.f32 %v1337_v10, %v3907_v7 }
 0x323   :  { %v1340_v51 = vrot.slane %v4199_v53, 1 }
 0x325   :  { %v4202_v56 = vand.u32 4294901760, %v1340_v51 }
 0x327   :  { %v1424_v32 = vsub.f32 %v1340_v51, %v4202_v56  ;;  %2803 = vmatmul.mubr.f32.vlgmr.msra.gmra.mrb[12].mxu1 %v4202_v56 }
 0x328   :  { %3307 = vmatpush3.bf16.msra.mxu1 %v3639_v11  ;;  %2872 = vmatprep.mubr.msk.f32.mxu1 %vm3393_vm0, %v3394_v4 }
 0x329   :  { %3308 = vmatprep.subr.bf16.mxu1 %v3392_v0  ;;  %v1425_v37 = vand.u32 4294901760, %v1424_v32 }
 0x32b   :  { %v1426_v21 = vsub.f32 %v1424_v32, %v1425_v37 }
 0x32c   :  { %3310 = vmatpush3.bf16.msra.mxu1 %v3648_v40 }
 0x32d   :  { %3311 = vmatprep.subr.bf16.mxu1 %v3392_v0  ;;  %v1427_v57 = vand.u32 4294901760, %v1426_v21 }
 0x32f   :  { %2768 = vmatmul.mubr.f32.vlgmr.msra.gmra.mrb[2].mxu0 %v1427_v57 }
 0x330   :  { %3283 = vmatpush3.bf16.msra.mxu0 %v4025_v52  ;;  %3313 = vmatpush3.bf16.msra.mxu1 %v3671_v46 }
 0x331   :  { %3284 = vmatprep.subr.bf16.mxu0 %v3392_v0  ;;  %3314 = vmatprep.subr.bf16.mxu1 %v3392_v0 }
 0x332   :  { %2837 = vmatprep.mubr.msk.f32.mxu0 %vm3393_vm0, %v3394_v4 }
 0x334   :  { %3286 = vmatpush3.bf16.msra.mxu0 %v4032_v54  ;;  %3316 = vmatpush3.bf16.msra.mxu1 %v3694_v49 }
 0x335   :  { %3287 = vmatprep.subr.bf16.mxu0 %v3392_v0  ;;  %3317 = vmatprep.subr.bf16.mxu1 %v3392_v0 }
 0x338   :  { %3289 = vmatpush3.bf16.msra.mxu0 %v4040_v47  ;;  %3319 = vmatpush3.bf16.msra.mxu1 %v3717_v20  ;;  %v1983_v47 = vrot.slane %v3907_v7, 6 }
 0x339   :  { %3290 = vmatprep.subr.bf16.mxu0 %v3392_v0  ;;  %3320 = vmatprep.subr.bf16.mxu1 %v3392_v0 }
 0x33c   :  { %3292 = vmatpush3.bf16.msra.mxu0 %v4046_v9  ;;  %3322 = vmatpush3.bf16.msra.mxu1 %v3730_v59 }
 0x33d   :  { %3293 = vmatprep.subr.bf16.mxu0 %v3392_v0  ;;  %3323 = vmatprep.subr.bf16.mxu1 %v3392_v0 }
 0x340   :  { %3295 = vmatpush3.bf16.msra.mxu0 %v4052_v33  ;;  %3325 = vmatpush3.bf16.msra.mxu1 %v3819_v31 }
 0x341   :  { %3296 = vmatprep.subr.bf16.mxu0 %v3392_v0  ;;  %3326 = vmatprep.subr.bf16.mxu1 %v3392_v0 }
 0x344   :  { %3298 = vmatpush3.bf16.msra.mxu0 %v4058_v42  ;;  %3328 = vmatpush3.bf16.msra.mxu1 %v3830_v61  ;;  %v1992_v42 = vsub.s32 5, %v4194_v60 }
 0x345   :  { %3299 = vmatprep.subr.bf16.mxu0 %v3392_v0  ;;  %3353 = vmatprep.subr.bf16.mxu1 %v3392_v0 }
 0x347   :  { %2873 = vmatmul.mubr.f32.vlgmr.msra.gmra.mrb[14].mxu1 %v1425_v37 }
 0x348   :  { %3301 = vmatpush3.bf16.msra.mxu0 %v3867_v17  ;;  %3355 = vmatpush3.bf16.msra.mxu1 %v3639_v11 }
 0x349   :  { %3302 = vmatprep.subr.bf16.mxu0 %v3392_v0  ;;  %3356 = vmatprep.subr.bf16.mxu1 %v3392_v0 }
 0x34a   :  { %2942 = vmatprep.mubr.msk.f32.mxu1 %vm3393_vm0, %v3394_v4 }
 0x34c   :  { %3304 = vmatpush3.bf16.msra.mxu0 %v3871_v19  ;;  %3358 = vmatpush3.bf16.msra.mxu1 %v3648_v40 }
 0x34d   :  { %3329 = vmatprep.subr.bf16.mxu0 %v3392_v0  ;;  %3359 = vmatprep.subr.bf16.mxu1 %v3392_v0 }
 0x34f   :  { %2838 = vmatmul.mubr.f32.vlgmr.msra.gmra.mrb[4].mxu0 %v1424_v32 }
 0x350   :  { %3331 = vmatpush3.bf16.msra.mxu0 %v4089_v50  ;;  %3361 = vmatpush3.bf16.msra.mxu1 %v3671_v46 }
 0x351   :  { %3332 = vmatprep.subr.bf16.mxu0 %v3392_v0  ;;  %3362 = vmatprep.subr.bf16.mxu1 %v3392_v0 }
 0x352   :  { %2907 = vmatprep.mubr.msk.f32.mxu0 %vm3393_vm0, %v3394_v4 }
 0x354   :  { %3334 = vmatpush3.bf16.msra.mxu0 %v4099_v39  ;;  %3364 = vmatpush3.bf16.msra.mxu1 %v3694_v49 }
 0x355   :  { %3335 = vmatprep.subr.bf16.mxu0 %v3392_v0  ;;  %3365 = vmatprep.subr.bf16.mxu1 %v3392_v0 }
 0x358   :  { %3337 = vmatpush3.bf16.msra.mxu0 %v4109_v58  ;;  %3367 = vmatpush3.bf16.msra.mxu1 %v3717_v20 }
 0x359   :  { %3338 = vmatprep.subr.bf16.mxu0 %v3392_v0  ;;  %3368 = vmatprep.subr.bf16.mxu1 %v3392_v0 }
 0x35c   :  { %3340 = vmatpush3.bf16.msra.mxu0 %v4117_v6  ;;  %3370 = vmatpush3.bf16.msra.mxu1 %v3730_v59 }
 0x35d   :  { %3341 = vmatprep.subr.bf16.mxu0 %v3392_v0  ;;  %3371 = vmatprep.subr.bf16.mxu1 %v3392_v0 }
 0x360   :  { %3343 = vmatpush3.bf16.msra.mxu0 %v4125_v12  ;;  %3373 = vmatpush3.bf16.msra.mxu1 %v3819_v31 }
 0x361   :  { %3344 = vmatprep.subr.bf16.mxu0 %v3392_v0  ;;  %3374 = vmatprep.subr.bf16.mxu1 %v3392_v0 }
 0x364   :  { %3346 = vmatpush3.bf16.msra.mxu0 %v4133_v13  ;;  %3376 = vmatpush3.bf16.msra.mxu1 %v3830_v61 }
 0x365   :  { %3347 = vmatprep.subr.bf16.mxu0 %v3392_v0 }
 0x367   :  { %2943 = vmatmul.mubr.f32.vlgmr.msra.gmra.mrb[16].mxu1 %v4202_v56 }
 0x368   :  { %3349 = vmatpush3.bf16.msra.mxu0 %v4141_v18 }
 0x369   :  { %3350 = vmatprep.subr.bf16.mxu0 %v3392_v0 }
 0x36c   :  { %3352 = vmatpush3.bf16.msra.mxu0 %v4149_v23 }
 0x36f   :  { %2908 = vmatmul.mubr.f32.vlgmr.msra.gmra.mrb[6].mxu0 %v4202_v56 }
 0x3fa   :  { %v1580_v4 = vpop.f32.mrb[12].mxu1 }
 0x3fb   :  { %v2804_v11 = vpop.f32.mrb[13].mxu1 }
 0x402   :  { %v1429_v40 = vpop.f32.mrb[2].mxu0 }
 0x403   :  { %v1581_v46 = vadd.f32 %v1580_v4, %v1429_v40  ;;  %v2769_v49 = vpop.f32.mrb[3].mxu0 }
 0x41a   :  { %v1773_v20 = vpop.f32.mrb[14].mxu1 }
 0x41b   :  { %v2874_v59 = vpop.f32.mrb[15].mxu1 }
 0x422   :  { %v1684_v31 = vpop.f32.mrb[4].mxu0 }
 0x423   :  { %v1685_v61 = vadd.f32 %v1684_v31, %v1581_v46  ;;  %v2839_v17 = vpop.f32.mrb[5].mxu0 }
 0x425   :  { %v1774_v19 = vadd.f32 %v1773_v20, %v1685_v61 }
 0x43a   :  { %v1979_v43 = vpop.f32.mrb[16].mxu1 }
 0x43b   :  { %v2944_v3 = vpop.f32.mrb[17].mxu1 }
 0x442   :  { %v1892_v22 = vpop.f32.mrb[6].mxu0 }
 0x443   :  { %v1893_v52 = vadd.f32 %v1892_v22, %v1774_v19  ;;  %v2909_v0 = vpop.f32.mrb[7].mxu0 }
 0x445   :  { %v1980_v54 = vadd.f32 %v1979_v43, %v1893_v52 }
 0x447   :  { %v1985_v9 = vadd.f32 %v1983_v47, %v1980_v54 }
 0x449   :  { %v1987_v33 = vrot.slane %v1985_v9, 3 }
 0x44b   :  { %v1989_v50 = vadd.f32 %v1987_v33, %v3907_v7 }
 0x44d   :  { %v1993_v39 = vrot.slane %v1989_v50, %v1992_v42 }
 0x44f   :  { %v1994_v58 = vadd.f32 %v1993_v39, %v4199_v53 }
 0x451   :  { %v1995_v6 = vmul.f32 %v1994_v58, %v1994_v58  ;;  %v2000_v63 = vmul.f32 0.5, %v1994_v58 }
 0x453   :  { %v1996_v12 = vmul.f32 %v1995_v6, %v1994_v58 }
 0x455   :  { %v1997_v13 = vmul.f32 0.044715, %v1996_v12 }
 0x457   :  { %v1998_v18 = vadd.f32 %v1997_v13, %v1994_v58 }
 0x459   :  { %v1999_v23 = vmul.f32 0.7978846, %v1998_v18 }
 0x45b   :  { %3390 = vtanh.f32 %v1999_v23 }
 0x465   :  { %v3391_v62 = vpop.eup %3390 }
 0x466   :  { %v2002_v1 = vadd.f32 1.0, %v3391_v62 }
 0x468   :  { %v2003_v2 = vmul.f32 %v2002_v1, %v2000_v63 }
 0x46a   :  { %2004 = vst [vmem:[%s4286_s1 - $0x1] sm:$0x6] %v2003_v2 }

</bundles_post_ra>
